<compile_context>
chip_gen: v7x
topology: tpu7x:2x2x1
jax: 0.10.0
libtpu: 0.0.40
codegen_flags: <defaults>
</compile_context>

<pallas_src>
import math
import functools

import jax
import jax.numpy as jnp
from jax.experimental import pallas as pl
from jax.experimental.pallas import tpu as pltpu


# ---------------- PE buffer ----------------

def make_sinusoidal_pe(seq_len: int, d_model: int, dtype=jnp.float32):
    """Deterministic positional-encoding buffer of shape (seq_len, d_model)."""
    position = jnp.arange(seq_len, dtype=jnp.float32)[:, None]              # (S, 1)
    div_term = jnp.exp(
        jnp.arange(0, d_model, 2, dtype=jnp.float32)
        * (-math.log(10000.0) / d_model)
    )                                                                        # (ceil(D/2),)
    sin = jnp.sin(position * div_term)
    cos = jnp.cos(position * div_term)
    pe = jnp.zeros((seq_len, d_model), dtype=jnp.float32)
    pe = pe.at[:, 0::2].set(sin[:, : (d_model + 1) // 2])
    pe = pe.at[:, 1::2].set(cos[:, : d_model // 2])
    return pe.astype(dtype)


# ---------------- kernels ----------------

def _pe_add_kernel(x_ref, pe_ref, o_ref):
    # x_ref: (TB, TR, L); pe_ref: (TR, L), broadcast over the batch-block axis.
    o_ref[...] = (x_ref[...] + pe_ref[...][None]).astype(o_ref.dtype)


def _pe_add_dropout_kernel(x_ref, pe_ref, bits_ref, o_ref, *, threshold, inv_keep):
    y = x_ref[...] + pe_ref[...][None]
    y = y * inv_keep                                   # fold 1/keep_prob scale
    keep = bits_ref[...] < jnp.uint32(threshold)       # integer-domain compare
    o_ref[...] = jnp.where(keep, y, jnp.zeros_like(y)).astype(o_ref.dtype)


# ---------------- tiling helpers ----------------

_SMALL_BYTES = 512 * 1024  # below this: single grid step covering everything


def _sublane_multiple(dtype) -> int:
    itemsize = jnp.dtype(dtype).itemsize
    return max(8, 32 // itemsize)  # 8 for f32, 16 for bf16, 32 for int8


def _choose_row_tile(R: int, L: int, dtype) -> int:
    """Pick a row-tile (~1 MiB per block), multiple of the sublane packing."""
    itemsize = jnp.dtype(dtype).itemsize
    sub = _sublane_multiple(dtype)
    target = max(sub, (1 << 20) // max(1, L * itemsize))
    target = max(sub, (target // sub) * sub)
    if R <= target:
        return R  # full extent along R -> single tile, no divisibility issue
    tr = target
    while tr >= sub:
        if R % tr == 0:
            return tr
        tr -= sub
    return target  # fallback: last block handled by Pallas edge masking


# ---------------- wrapper ----------------

class PositionalEncoding:
    def __init__(self, d_model: int, seq_len: int, dropout: float,
                 dtype=jnp.float32):
        self.d_model = d_model
        self.seq_len = seq_len
        self.p = float(dropout)
        self.pe = make_sinusoidal_pe(seq_len, d_model, dtype=dtype)  # (S, D)

    def __call__(self, x, *, training: bool = False, seed: int = 0):
        B, S, D = x.shape
        assert S <= self.seq_len and D == self.d_model
        pe = self.pe[:S, :].astype(x.dtype)  # store / add in activation dtype

        # Lane-dense folding: (S, D) -> (R, 128) preserves the elementwise
        # correspondence of x[b] + pe whenever S*D % 128 == 0.
        if (S * D) % 128 == 0:
            L = 128
            R = (S * D) // 128
        else:
            # TODO(synk): pad D up to 128 for lane-dense stores when S*D % 128 != 0
            L = D
            R = S
        xr = x.reshape(B, R, L)
        per = pe.reshape(R, L)

        itemsize = jnp.dtype(x.dtype).itemsize
        total_bytes = B * R * L * itemsize
        if total_bytes <= _SMALL_BYTES:
            TB, TR = B, R  # one grid step: whole problem in a single block
        else:
            TB, TR = 1, _choose_row_tile(R, L, x.dtype)

        # Batch innermost so pe's block index is unchanged across b -> pe stays
        # resident in VMEM for a whole R tile.
        grid = (pl.cdiv(R, TR), pl.cdiv(B, TB))
        x_spec = pl.BlockSpec((TB, TR, L), lambda r, b: (b, r, 0))
        pe_spec = pl.BlockSpec((TR, L), lambda r, b: (r, 0))
        out_shape = jax.ShapeDtypeStruct((B, R, L), x.dtype)
        cparams = pltpu.CompilerParams(
            dimension_semantics=("parallel", "parallel"),
            vmem_limit_bytes=32 * 1024 * 1024,
        )

        if (not training) or self.p == 0.0:
            out = pl.pallas_call(
                _pe_add_kernel,
                out_shape=out_shape,
                grid=grid,
                in_specs=[x_spec, pe_spec],
                out_specs=x_spec,
                compiler_params=cparams,
            )(xr, per)
            return out.reshape(B, S, D)

        keep_prob = 1.0 - self.p
        threshold = min(int(keep_prob * 4294967296.0), 4294967295)
        bits = jax.random.bits(jax.random.PRNGKey(seed), (B, R, L),
                               dtype=jnp.uint32)
        out = pl.pallas_call(
            functools.partial(_pe_add_dropout_kernel,
                              threshold=threshold, inv_keep=1.0 / keep_prob),
            out_shape=out_shape,
            grid=grid,
            in_specs=[x_spec, pe_spec, x_spec],
            out_specs=x_spec,
            compiler_params=cparams,
        )(xr, per, bits)
        return out.reshape(B, S, D)


# ---------------- self-test ----------------

if __name__ == "__main__":
    key = jax.random.PRNGKey(0)

    # Tiny shapes consistent with the module: batch=2, seq=8, d_model=32
    B, S, D = 2, 8, 32
    x = jax.random.normal(key, (B, S, D), dtype=jnp.float32)
    module = PositionalEncoding(d_model=D, seq_len=S, dropout=0.1)

    # eval path (dropout = identity)
    out_eval = jax.block_until_ready(module(x, training=False))
    ref = x + module.pe[None, :S, :]
    assert out_eval.shape == (B, S, D)
    assert jnp.allclose(out_eval, ref, atol=1e-6, rtol=1e-6), "eval mismatch"

    # training path (inverted dropout with integer-threshold compare)
    seed = 123
    out_train = jax.block_until_ready(module(x, training=True, seed=seed))
    keep_prob = 1.0 - module.p
    threshold = min(int(keep_prob * 4294967296.0), 4294967295)
    bits = jax.random.bits(jax.random.PRNGKey(seed), (B, (S * D) // 128, 128),
                           dtype=jnp.uint32)
    keep = (bits < jnp.uint32(threshold)).reshape(B, S, D)
    ref_train = jnp.where(keep, ref * (1.0 / keep_prob), 0.0)
    assert jnp.allclose(out_train, ref_train, atol=1e-5, rtol=1e-5), \
        "train mismatch"

    # Medium case: exercises the tiled (multi-step grid) path, pe resident
    # across the batch axis, lane-dense 1 MiB blocks.
    B2, S2, D2 = 2, 2048, 256
    x2 = jax.random.normal(jax.random.PRNGKey(1), (B2, S2, D2), dtype=jnp.float32)
    module2 = PositionalEncoding(d_model=D2, seq_len=S2, dropout=0.1)
    out2 = jax.block_until_ready(module2(x2, training=False))
    ref2 = x2 + module2.pe[None, :S2, :]
    assert jnp.allclose(out2, ref2, atol=1e-6, rtol=1e-6), "tiled eval mismatch"

    print("KERNEL_OK")
</pallas_src>

<mosaic_0001>
module attributes {stable_mosaic.version = 11 : i64} {
  func.func @_pe_add_kernel(%arg0: i32, %arg1: i32, %arg2: memref<2x2x128xf32, #tpu.memory_space<vmem>>, %arg3: memref<2x128xf32, #tpu.memory_space<vmem>>, %arg4: memref<2x2x128xf32, #tpu.memory_space<vmem>>) attributes {dimension_semantics = [#tpu.dimension_semantics<parallel>, #tpu.dimension_semantics<parallel>], iteration_bounds = array<i64: 1, 1>, scalar_prefetch = 0 : i64, scratch_operands = 0 : i64, tpu.core_type = #tpu.core_type<tc>, window_params = [{transform_indices = @transform_0, window_bounds = array<i64: 2, 2, 128>}, {transform_indices = @transform_1, window_bounds = array<i64: 2, 128>}, {transform_indices = @transform_2, window_bounds = array<i64: 2, 2, 128>}]} {
    %c0 = arith.constant 0 : index
    %c0_0 = arith.constant 0 : index
    %c0_1 = arith.constant 0 : index
    %0 = vector.load %arg2[%c0, %c0_0, %c0_1] : memref<2x2x128xf32, #tpu.memory_space<vmem>>, vector<2x2x128xf32>
    %c0_2 = arith.constant 0 : index
    %c0_3 = arith.constant 0 : index
    %1 = vector.load %arg3[%c0_2, %c0_3] : memref<2x128xf32, #tpu.memory_space<vmem>>, vector<2x128xf32>
    %2 = vector.shape_cast %1 : vector<2x128xf32> to vector<1x2x128xf32>
    %3 = vector.broadcast %2 : vector<1x2x128xf32> to vector<2x2x128xf32>
    %4 = arith.addf %0, %3 : vector<2x2x128xf32>
    %c0_4 = arith.constant 0 : index
    %c0_5 = arith.constant 0 : index
    %c0_6 = arith.constant 0 : index
    %5 = vector.load %arg4[%c0_4, %c0_5, %c0_6] : memref<2x2x128xf32, #tpu.memory_space<vmem>>, vector<2x2x128xf32>
    tpu.vector_store %arg4[%c0_4, %c0_5, %c0_6], %4 {strides = array<i32>} : memref<2x2x128xf32, #tpu.memory_space<vmem>>, vector<2x2x128xf32>,
    return
  }
  func.func @transform_0(%arg0: i32, %arg1: i32) -> (i32, i32, i32) {
    %c0_i32 = arith.constant 0 : i32
    %c0_i32_0 = arith.constant 0 : i32
    return %arg1, %arg0, %c0_i32 : i32, i32, i32
  }
  func.func @transform_1(%arg0: i32, %arg1: i32) -> (i32, i32) {
    %c0_i32 = arith.constant 0 : i32
    %c0_i32_0 = arith.constant 0 : i32
    return %arg0, %c0_i32 : i32, i32
  }
  func.func @transform_2(%arg0: i32, %arg1: i32) -> (i32, i32, i32) {
    %c0_i32 = arith.constant 0 : i32
    %c0_i32_0 = arith.constant 0 : i32
    return %arg1, %arg0, %c0_i32 : i32, i32, i32
  }
}

</mosaic_0001>

<bundles_post_ra>
// kernel: tpu_custom_call.1
= control target key start
LH: loop header
LB: loop body
LE: loop exit
PB: predicated region body
PF: predicated region fallthrough
CT: control target
= control target key end

     0   :  { %7 = vsyncpa [#allocation3], 0  ;;  %s154_s0 = inlined_call_operand.hbm [shape: f32[2,2,128], index: 0, kind: input, shape index: {}]   ;;  %s155_s1 = inlined_call_operand.vmem [shape: f32[2,128], index: 1, kind: input, shape index: {}]   ;;  %s156_s2 = inlined_call_operand.hbm [shape: f32[2,2,128], index: 2, kind: output, shape index: {}]  }
   0x1   :  { %8 = vsyncpa [#allocation4], 0  ;;  %s102_s9 = smov [#allocation2]   ;;  %s54_s13 = scalar_lea.hbm %s154_s0, 64 }
   0x2   :  { %s14_s10 = sshll.u32 %s102_s9, 4  ;;  %p55_p0 = scmp.ne.s32.totalorder %s154_s0, %s54_s13  ;;  %s15_s10 = int_to_ptr.vmem [resolvable:$true] %s14_s10 }
   0x3   :  { %p58_p1 = scmp.lt.u32.totalorder %s54_s13, %s154_s0 }
   0x5   :  { %p60_p2 = pnand %p58_p1, %p55_p0 }
   0x7   :  { %63 = shalt.err (!%p60_p2)
}
   0x8   :  { %s64_s18 = scalar_lea.vmem %s15_s10, 64  ;;  %p69_p4 = scmp.lt.s32.totalorder %s15_s10, %s15_s10 }
   0x9   :  { %p65_p3 = scmp.ne.s32.totalorder %s15_s10, %s64_s18  ;;  %p70_p5 = scmp.lt.s32.totalorder %s64_s18, %s64_s18 }
   0xb   :  { %p71_p6 = por %p70_p5, %p69_p4 }
   0xd   :  { %p72_p7 = pnand %p71_p6, %p65_p3 }
   0xf   :  { %75 = shalt.err (!%p72_p7)
}
  0x10   :  { %s103_s19 = smov 32   ;;  %s104_s20 = smov 2  }
  0x11   :  { %20 = dma.hbm_to_vmem [thread:$0]  %s154_s0, 64, %s15_s10, [#allocation3], %s103_s19, %s103_s19, %s104_s20  }
  0x12   :  { %98 = dma.done.wait [#allocation3], 64  }
  0x13   :  { %99 = vsyncadd [#allocation3], 4294967232  ;;  %s105_s23 = smov [#allocation5]   ;;  %v26_v0 = vld [vmem:[#allocation2] sm:$0x3] }
  0x14   :  { %s38_s24 = sshll.u32 %s105_s23, 4  ;;  %v28_v1 = vld [vmem:[%s155_s1] sm:$0x3]  ;;  %v27_v2 = vld [vmem:[#allocation2 + $0x2] sm:$0x3]  ;;  %s39_s24 = int_to_ptr.vmem [resolvable:$true] %s38_s24 }
  0x15   :  { %v29_v3 = vadd.f32 %v28_v1, %v26_v0  ;;  %v30_v4 = vadd.f32 %v28_v1, %v27_v2  ;;  %s76_s27 = scalar_lea.vmem %s39_s24, 64  ;;  %p81_p9 = scmp.lt.s32.totalorder %s39_s24, %s39_s24 }
  0x16   :  { %p77_p8 = scmp.ne.s32.totalorder %s39_s24, %s76_s27  ;;  %p82_p10 = scmp.lt.s32.totalorder %s76_s27, %s76_s27 }
  0x17   :  { %31 = vst [vmem:[#allocation5] sm:$0x3] %v29_v3  ;;  %32 = vst [vmem:[#allocation5 + $0x2] sm:$0x3] %v30_v4 }
  0x18   :  { %p83_p11 = por %p82_p10, %p81_p9 }
  0x1a   :  { %p84_p12 = pnand %p83_p11, %p77_p8 }
  0x1c   :  { %87 = shalt.err (!%p84_p12)
}
  0x1d   :  { %s88_s29 = scalar_lea.hbm %s156_s2, 64 }
  0x1e   :  { %p89_p13 = scmp.ne.s32.totalorder %s156_s2, %s88_s29  ;;  %p92_p0 = scmp.lt.u32.totalorder %s88_s29, %s156_s2 }
  0x20   :  { %p94_p1 = pnand %p92_p0, %p89_p13 }
  0x22   :  { %97 = shalt.err (!%p94_p1)
}
  0x23   :  { %44 = dma.vmem_to_hbm [thread:$0]  %s39_s24, 64, %s156_s2, [#allocation4], %s103_s19, %s103_s19, %s104_s20  }
  0x24   :  { %100 = dma.done.wait [#allocation4], 64  }
  0x25   :  { %101 = vsyncadd [#allocation4], 4294967232 }
  0x26   :  { %48 = vsyncpa [#allocation3], 1 }
  0x27   :  { %49 = vsyncpa [#allocation4], 1 }

</bundles_post_ra>
